<compile_context>
chip_gen: v5e
topology: v5e:2x2
jax: 0.10.0
libtpu: 0.0.40
codegen_flags: <defaults>
</compile_context>

<pallas_src>
import jax
import jax.numpy as jnp
from jax.experimental import pallas as pl
from jax.experimental.pallas import tpu as pltpu


def _make_divisible(ch, divisor=8, min_ch=None):
    if min_ch is None:
        min_ch = divisor
    new_ch = max(min_ch, int(ch + divisor / 2) // divisor * divisor)
    if new_ch < 0.9 * ch:
        new_ch += divisor
    return new_ch


def _se_kernel(x_ref, w1t_ref, b1_ref, w2t_ref, b2_ref, o_ref):
    # x_ref / o_ref: (B_tile, C, HW) slab; w1t: (C, Cs); w2t: (Cs, C);
    # b1: (1, Cs); b2: (1, C).
    hw = x_ref.shape[-1]

    # adaptive_avg_pool2d -> (1,1): mean over the lane (spatial) axis, f32 acc.
    avg = jnp.sum(x_ref[...], axis=-1, dtype=jnp.float32) * (1.0 / hw)  # (B, C)

    # fc1 (1x1 conv) + ReLU: (B, C) @ (C, Cs). Weights consumed natively by MXU.
    s = jnp.dot(avg, w1t_ref[...], preferred_element_type=jnp.float32) + b1_ref[...]
    s = jnp.maximum(s, 0.0)

    # fc2 (1x1 conv) + Hardsigmoid (relu6(x+3)/6): (B, Cs) @ (Cs, C).
    s = jnp.dot(s, w2t_ref[...], preferred_element_type=jnp.float32) + b2_ref[...]
    s = jnp.clip((s + 3.0) * (1.0 / 6.0), 0.0, 1.0)                      # (B, C)

    # scale * x: per-(batch,channel) scalar broadcast over lanes; multiply in
    # f32 (type promotion) and downcast once at the store.
    o_ref[...] = (s[:, :, None] * x_ref[...]).astype(o_ref.dtype)


def _choose_b_tile(n, per_elem_bytes, target_step_bytes=4 << 20, min_grid=4):
    """Largest divisor of n whose per-step slab fits the byte budget, preferring
    tiles that keep the parallel grid length >= min_grid (v7x 2-TC occupancy /
    pipeline depth >= 2 per core)."""
    divisors = [b for b in range(1, n + 1) if n % b == 0]
    fitting = [b for b in divisors if b * per_elem_bytes <= target_step_bytes] or [1]
    preferred = [b for b in fitting if n // b >= min(min_grid, n)]
    return max(preferred) if preferred else max(fitting)


def squeeze_excitation(x_nchw, w1, b1, w2, b2):
    """x_nchw: (N, C, H, W); w1: (Cs, C); b1: (Cs,); w2: (C, Cs); b2: (C,)"""
    N, C, H, W = x_nchw.shape
    Cs = w1.shape[0]
    HW = H * W
    itemsize = jnp.dtype(x_nchw.dtype).itemsize

    # Free reshape of contiguous NCHW — no transpose, no extra HBM traffic.
    x = x_nchw.reshape(N, C, HW)
    # One-time (tiny) weight transposes in the wrapper; bias rows for broadcast.
    w1t = w1.T            # (C, Cs)
    w2t = w2.T            # (Cs, C)
    b1r = b1.reshape(1, Cs)
    b2r = b2.reshape(1, C)

    # Batch-tile so each grid step moves ~1-4 MB of HBM (in + out).
    per_elem_bytes = 2 * C * HW * itemsize
    b_tile = _choose_b_tile(N, per_elem_bytes)
    grid_n = N // b_tile

    # TODO(synk): for feature maps whose per-element slab exceeds the per-gen
    # VMEM budget (~12 MB on v7x, ~25 MB on v5e/v6e) add the two-pass
    # (pool-accumulate, then re-read + scale) path over an HW-tile grid axis
    # marked "arbitrary".
    # TODO(synk): for the 14x14 / 7x7 SE stages (HW=196/49, not lane-dense)
    # consider a channels-on-lanes (HW, C) presentation or packing batch
    # elements into the lane dimension to avoid masked stores.

    cost = pl.CostEstimate(
        flops=2 * N * (C * Cs + Cs * C) + 2 * N * C * HW,
        transcendentals=0,
        bytes_accessed=2 * N * C * HW * itemsize
        + (w1.size + w2.size + b1.size + b2.size) * jnp.dtype(w1.dtype).itemsize,
    )

    out = pl.pallas_call(
        _se_kernel,
        out_shape=jax.ShapeDtypeStruct((N, C, HW), x_nchw.dtype),
        grid_spec=pltpu.PrefetchScalarGridSpec(
            num_scalar_prefetch=0,
            grid=(grid_n,),
            in_specs=[
                pl.BlockSpec((b_tile, C, HW), lambda b: (b, 0, 0)),  # x slab
                pl.BlockSpec((C, Cs), lambda b: (0, 0)),             # fc1 weight^T
                pl.BlockSpec((1, Cs), lambda b: (0, 0)),             # fc1 bias row
                pl.BlockSpec((Cs, C), lambda b: (0, 0)),             # fc2 weight^T
                pl.BlockSpec((1, C), lambda b: (0, 0)),              # fc2 bias row
            ],
            out_specs=pl.BlockSpec((b_tile, C, HW), lambda b: (b, 0, 0)),
        ),
        compiler_params=pltpu.CompilerParams(
            dimension_semantics=("parallel",),
            vmem_limit_bytes=48 << 20,   # safe on v7x (64 MiB), ample on v5e/v6e
        ),
        cost_estimate=cost,
        # Note: callers that can donate x may additionally pass
        # input_output_aliases={0: 0} to save the output HBM allocation.
    )(x, w1t, b1r, w2t, b2r)

    return out.reshape(N, C, H, W)


def _reference(x_nchw, w1, b1, w2, b2):
    # pure-JAX reference of the PyTorch forward (NCHW)
    avg = jnp.mean(x_nchw, axis=(2, 3))                       # (N, C)
    s = avg @ w1.T + b1                                       # (N, Cs)
    s = jnp.maximum(s, 0.0)
    s = s @ w2.T + b2                                         # (N, C)
    s = jnp.clip((s + 3.0) / 6.0, 0.0, 1.0)
    return s[:, :, None, None] * x_nchw


if __name__ == "__main__":
    N, C, H, W = 2, 16, 16, 16
    squeeze_c = _make_divisible(C // 4, 8)                    # = 8 for C=16

    key = jax.random.PRNGKey(0)
    kx, k1, k2, k3, k4 = jax.random.split(key, 5)
    x = jax.random.normal(kx, (N, C, H, W), dtype=jnp.float32)
    # nn.Conv2d(kernel_size=1) weights, squeezed to (out_c, in_c)
    w1 = 0.1 * jax.random.normal(k1, (squeeze_c, C), dtype=jnp.float32)
    b1 = 0.1 * jax.random.normal(k2, (squeeze_c,), dtype=jnp.float32)
    w2 = 0.1 * jax.random.normal(k3, (C, squeeze_c), dtype=jnp.float32)
    b2 = 0.1 * jax.random.normal(k4, (C,), dtype=jnp.float32)

    out = squeeze_excitation(x, w1, b1, w2, b2)
    out = jax.block_until_ready(out)

    ref = _reference(x, w1, b1, w2, b2)
    assert out.shape == (N, C, H, W)
    assert jnp.allclose(out, ref, atol=1e-5, rtol=1e-5)
    print("KERNEL_OK")
</pallas_src>

<mosaic_0001>
module attributes {stable_mosaic.version = 11 : i64} {
  func.func @_se_kernel(%arg0: i32, %arg1: memref<1x16x256xf32, #tpu.memory_space<vmem>>, %arg2: memref<16x8xf32, #tpu.memory_space<vmem>>, %arg3: memref<1x8xf32, #tpu.memory_space<vmem>>, %arg4: memref<8x16xf32, #tpu.memory_space<vmem>>, %arg5: memref<1x16xf32, #tpu.memory_space<vmem>>, %arg6: memref<1x16x256xf32, #tpu.memory_space<vmem>>) attributes {dimension_semantics = [#tpu.dimension_semantics<parallel>], iteration_bounds = array<i64: 2>, scalar_prefetch = 0 : i64, scratch_operands = 0 : i64, tpu.core_type = #tpu.core_type<tc>, window_params = [{transform_indices = @transform_0, window_bounds = array<i64: 1, 16, 256>}, {pipeline_mode = #tpu.pipeline_mode<synchronous>, transform_indices = @transform_1, window_bounds = array<i64: 16, 8>}, {pipeline_mode = #tpu.pipeline_mode<synchronous>, transform_indices = @transform_2, window_bounds = array<i64: 1, 8>}, {pipeline_mode = #tpu.pipeline_mode<synchronous>, transform_indices = @transform_3, window_bounds = array<i64: 8, 16>}, {pipeline_mode = #tpu.pipeline_mode<synchronous>, transform_indices = @transform_4, window_bounds = array<i64: 1, 16>}, {transform_indices = @transform_5, window_bounds = array<i64: 1, 16, 256>}]} {
    %c0 = arith.constant 0 : index
    %c0_0 = arith.constant 0 : index
    %c0_1 = arith.constant 0 : index
    %0 = vector.load %arg1[%c0, %c0_0, %c0_1] : memref<1x16x256xf32, #tpu.memory_space<vmem>>, vector<1x16x256xf32>
    %cst = arith.constant dense<0.000000e+00> : vector<1x16xf32>
    %1 = vector.multi_reduction <add>, %0, %cst [2] : vector<1x16x256xf32> to vector<1x16xf32>
    %cst_2 = arith.constant 3.906250e-03 : f32
    %2 = vector.broadcast %cst_2 : f32 to vector<1x16xf32>
    %3 = arith.mulf %1, %2 : vector<1x16xf32>
    %c0_3 = arith.constant 0 : index
    %c0_4 = arith.constant 0 : index
    %4 = vector.load %arg2[%c0_3, %c0_4] : memref<16x8xf32, #tpu.memory_space<vmem>>, vector<16x8xf32>
    %cst_5 = arith.constant dense<0.000000e+00> : vector<1x8xf32>
    %5 = tpu.matmul %3, %4, %cst_5 {dimension_numbers = #tpu.dot_dimension_numbers<[1], [0], [0], [1], [0, 0, 1, 1], [], []>} : vector<1x16xf32>, vector<16x8xf32>, vector<1x8xf32> -> vector<1x8xf32>
    %c0_6 = arith.constant 0 : index
    %c0_7 = arith.constant 0 : index
    %6 = vector.load %arg3[%c0_6, %c0_7] : memref<1x8xf32, #tpu.memory_space<vmem>>, vector<1x8xf32>
    %7 = arith.addf %5, %6 : vector<1x8xf32>
    %cst_8 = arith.constant 0.000000e+00 : f32
    %8 = vector.broadcast %cst_8 : f32 to vector<1x8xf32>
    %9 = arith.maximumf %7, %8 : vector<1x8xf32>
    %c0_9 = arith.constant 0 : index
    %c0_10 = arith.constant 0 : index
    %10 = vector.load %arg4[%c0_9, %c0_10] : memref<8x16xf32, #tpu.memory_space<vmem>>, vector<8x16xf32>
    %cst_11 = arith.constant dense<0.000000e+00> : vector<1x16xf32>
    %11 = tpu.matmul %9, %10, %cst_11 {dimension_numbers = #tpu.dot_dimension_numbers<[1], [0], [0], [1], [0, 0, 1, 1], [], []>} : vector<1x8xf32>, vector<8x16xf32>, vector<1x16xf32> -> vector<1x16xf32>
    %c0_12 = arith.constant 0 : index
    %c0_13 = arith.constant 0 : index
    %12 = vector.load %arg5[%c0_12, %c0_13] : memref<1x16xf32, #tpu.memory_space<vmem>>, vector<1x16xf32>
    %13 = arith.addf %11, %12 : vector<1x16xf32>
    %cst_14 = arith.constant 3.000000e+00 : f32
    %14 = vector.broadcast %cst_14 : f32 to vector<1x16xf32>
    %15 = arith.addf %13, %14 : vector<1x16xf32>
    %cst_15 = arith.constant 0.166666672 : f32
    %16 = vector.broadcast %cst_15 : f32 to vector<1x16xf32>
    %17 = arith.mulf %15, %16 : vector<1x16xf32>
    %cst_16 = arith.constant 0.000000e+00 : f32
    %cst_17 = arith.constant 1.000000e+00 : f32
    %18 = vector.broadcast %cst_16 : f32 to vector<1x16xf32>
    %19 = arith.maximumf %18, %17 : vector<1x16xf32>
    %20 = vector.broadcast %cst_17 : f32 to vector<1x16xf32>
    %21 = arith.minimumf %20, %19 : vector<1x16xf32>
    %22 = vector.shape_cast %21 : vector<1x16xf32> to vector<1x16x1xf32>
    %c0_18 = arith.constant 0 : index
    %c0_19 = arith.constant 0 : index
    %c0_20 = arith.constant 0 : index
    %23 = vector.load %arg1[%c0_18, %c0_19, %c0_20] : memref<1x16x256xf32, #tpu.memory_space<vmem>>, vector<1x16x256xf32>
    %24 = vector.broadcast %22 : vector<1x16x1xf32> to vector<1x16x256xf32>
    %25 = arith.mulf %24, %23 : vector<1x16x256xf32>
    %c0_21 = arith.constant 0 : index
    %c0_22 = arith.constant 0 : index
    %c0_23 = arith.constant 0 : index
    %26 = vector.load %arg6[%c0_21, %c0_22, %c0_23] : memref<1x16x256xf32, #tpu.memory_space<vmem>>, vector<1x16x256xf32>
    tpu.vector_store %arg6[%c0_21, %c0_22, %c0_23], %25 {strides = array<i32>} : memref<1x16x256xf32, #tpu.memory_space<vmem>>, vector<1x16x256xf32>,
    return
  }
  func.func @transform_0(%arg0: i32) -> (i32, i32, i32) {
    %c0_i32 = arith.constant 0 : i32
    %c0_i32_0 = arith.constant 0 : i32
    %c0_i32_1 = arith.constant 0 : i32
    return %arg0, %c0_i32, %c0_i32_0 : i32, i32, i32
  }
  func.func @transform_1(%arg0: i32) -> (i32, i32) {
    %c0_i32 = arith.constant 0 : i32
    %c0_i32_0 = arith.constant 0 : i32
    %c0_i32_1 = arith.constant 0 : i32
    return %c0_i32, %c0_i32_0 : i32, i32
  }
  func.func @transform_2(%arg0: i32) -> (i32, i32) {
    %c0_i32 = arith.constant 0 : i32
    %c0_i32_0 = arith.constant 0 : i32
    %c0_i32_1 = arith.constant 0 : i32
    return %c0_i32, %c0_i32_0 : i32, i32
  }
  func.func @transform_3(%arg0: i32) -> (i32, i32) {
    %c0_i32 = arith.constant 0 : i32
    %c0_i32_0 = arith.constant 0 : i32
    %c0_i32_1 = arith.constant 0 : i32
    return %c0_i32, %c0_i32_0 : i32, i32
  }
  func.func @transform_4(%arg0: i32) -> (i32, i32) {
    %c0_i32 = arith.constant 0 : i32
    %c0_i32_0 = arith.constant 0 : i32
    %c0_i32_1 = arith.constant 0 : i32
    return %c0_i32, %c0_i32_0 : i32, i32
  }
  func.func @transform_5(%arg0: i32) -> (i32, i32, i32) {
    %c0_i32 = arith.constant 0 : i32
    %c0_i32_0 = arith.constant 0 : i32
    %c0_i32_1 = arith.constant 0 : i32
    return %arg0, %c0_i32, %c0_i32_0 : i32, i32, i32
  }
}

</mosaic_0001>

<bundles_post_ra>
// kernel: tpu_custom_call.1
= control target key start
LH: loop header
LB: loop body
LE: loop exit
PB: predicated region body
PF: predicated region fallthrough
CT: control target
= control target key end

     0   :  { %10 = vsyncpa [#allocation3], 0  ;;  %s782_s0 = inlined_call_operand.hbm [shape: f32[2,16,256], index: 0, kind: input, shape index: {}]   ;;  %s783_s1 = inlined_call_operand.vmem [shape: f32[16,8], index: 1, kind: input, shape index: {}]   ;;  %s784_s2 = inlined_call_operand.vmem [shape: f32[1,8], index: 2, kind: input, shape index: {}]   ;;  %s785_s3 = inlined_call_operand.vmem [shape: f32[8,16], index: 3, kind: input, shape index: {}]   ;;  %s786_s4 = inlined_call_operand.vmem [shape: f32[1,16], index: 4, kind: input, shape index: {}]   ;;  %s787_s5 = inlined_call_operand.hbm [shape: f32[2,16,256], index: 5, kind: output, shape index: {}]  }
   0x1   :  { %12 = vsyncpa [#allocation3 + $0x1], 0 }
   0x2   :  { %13 = vsyncpa [#allocation4], 0 }
   0x3   :  { %15 = vsyncpa [#allocation4 + $0x1], 0  ;;  %s636_s18 = smov 0   ;;  %s638_s19 = smov 0  }
   0x4   :  { %s640_s20 = smov 0   ;;  %s642_s21 = smov 0  }
   0x5 LB: > { %s657_s22 = sadd.s32 4294967295, %s600_s21   ;;  %s433_s23 = sadd.s32 4294967294, %s600_s21   ;;  %s600_s21 = sphi %s642_s21, %s797_s21   ;;  %s596_s20 = sphi %s640_s20, %s796_s20   ;;  %s592_s19 = sphi %s638_s19, %s795_s19   ;;  %s588_s18 = sphi %s636_s18, %s794_s18  }
   0x6   : > { %s661_s24 = sadd.s32 1, %s600_s21   ;;  %s28_s25 = sadd.s32 1, %s596_s20 }
   0x7   : > { %s25_s26 = ssub.s32 %s600_s21, %s661_s24  ;;  %p35_p0 = scmp.ne.s32.totalorder %s596_s20, %s592_s19 }
   0x8   : > { %p26_p1 = scmp.eq.s32.totalorder %s25_s26, 0  ;;  %p36_p2 = scmp.eq.s32.totalorder %s600_s21, 0 }
   0x9   : > { %p41_p3 = scmp.ne.s32.totalorder %s592_s19, %s588_s18  ;;  %p42_p4 = scmp.eq.s32.totalorder %s657_s22, 0 }
   0xa   : > { %s673_s27 = scalar_select %p26_p1, %s596_s20, %s28_s25  }
   0xb   : > { %p675_p5 = por %p36_p2, %p35_p0  ;;  %p679_p6 = por %p42_p4, %p41_p3 }
   0xc   : > { %p149_p7 = scmp.eq.s32.totalorder %s657_s22, 1  ;;  %p155_p8 = scmp.eq.s32.totalorder %s433_s23, 1 }
   0xd   : > { %p463_p10 = scmp.lt.s32.totalorder %s600_s21, 2  ;;  %s187_s7 = sand.u32 1, %s596_s20  }
   0xe   : > { %p686_p11 = por %p149_p7, %p35_p0  ;;  %p690_p12 = por %p155_p8, %p41_p3 }
   0xf   : > { %s449_s8 = sshll.u32 %s600_s21, 5  ;;  %s436_s9 = sshll.u32 %s187_s7, 5 }
  0x10   : > { %s196_s12 = scalar_lea.hbm %s782_s0, %s449_s8  ;;  %s191_s14 = scalar_lea.vmem [#allocation2], %s436_s9 }
  0x11   : > { %s197_s13 = sshll.u32 %s196_s12, 4  ;;  %s199_s15 = sshll.u32 %s191_s14, 4  ;;  %s198_s13 = int_to_ptr.hbm [resolvable:$true] %s197_s13  ;;  %s200_s15 = int_to_ptr.vmem [resolvable:$true] %s199_s15 }
  0x12   : > { %p701_p13 = pnand %p463_p10, %p675_p5  ;;  %p439_p0 = scmp.ge.s32.totalorder %s600_s21, 1 }
  0x13   : > { %p207_p1 = scmp.lt.s32.totalorder %s600_s21, 3  ;;  %s188_s17 = scalar_lea.sflag [#allocation3], %s187_s7 }
  0x14   : > { %s504_s23 = sshra.s32 %s198_s13, 4  ;;  %p508_p3 = pneg %p701_p13  ;;  %s505_s23 = int_to_ptr.hbm [resolvable:$true] %s504_s23 }
  0x15   : > { %s506_s25 = scalar_lea.hbm %s505_s23, 32  ;;  %s511_s28 = scalar_lea.hbm %s782_s0, 64 }
  0x16   : > { %p507_p2 = scmp.ne.s32.totalorder %s505_s23, %s506_s25  ;;  %p512_p5 = scmp.lt.s32.totalorder %s505_s23, %s782_s0 }
  0x17   : > { %p513_p8 = scmp.lt.s32.totalorder %s511_s28, %s506_s25 }
  0x18   : > { %p509_p4 = pnand %p508_p3, %p507_p2 }
  0x19   : > { %p514_p10 = por %p513_p8, %p512_p5 }
  0x1a   : > { %p510_p7 = pneg %p509_p4 }
  0x1c   : > { %p515_p9 = pnand %p514_p10, %p510_p7 }
  0x1e   : > { %518 = shalt.err (!%p515_p9)
}
  0x1f   : > { %s602_s7 = smov 256   ;;  %s603_s11 = smov 16  }
  0x20   : > { %458 = dma.hbm_to_vmem [thread:$0]  (!%p701_p13), %s198_s13, 512, %s200_s15, %s188_s17, %s602_s7, %s602_s7, %s603_s11  }
  0x21   : > { %p208_p2 = pnand %p439_p0, %p207_p1 }
  0x22   : > { %s722_s12 = sand.u32 (!%p208_p2), 1, %s592_s19  }
  0x23   : > { %211 = sbr.rel (%p208_p2) target bundleno = 579 (0x243), region = 40  ;;  %s440_s14 = sshll.u32 (!%p208_p2), %s722_s12, 5 }
  0x24   : > { %s214_s23 = scalar_lea.sflag (!%p208_p2), [#allocation3], %s722_s12  ;;  %s217_s25 = scalar_lea.vmem (!%p208_p2), [#allocation2], %s440_s14 }
  0x28   : > { %579 = dma.done.wait (%p679_p6), %s214_s23, 512  }
  0x29   : > { %581 = vsyncadd (%p679_p6), %s214_s23, 4294966784  ;;  %v245_v0 = vld [vmem:[%s217_s25] sm:$0xff]  ;;  %v246_v1 = vld [vmem:[%s217_s25 + $0x8] sm:$0xff]  ;;  %v262_v9 = vlaneseq  ;;  %vm267_vm0 = vcmask 130112   ;;  %vm269_vm1 = vcmask 130048   ;;  %vm295_vm2 = vcmask 64512  }
  0x2a   : > { %v249_v2 = vadd.f32 %v246_v1, %v245_v0  ;;  %v247_v3 = vld [vmem:[%s217_s25 + $0x10] sm:$0xff]  ;;  %v248_v4 = vld [vmem:[%s217_s25 + $0x18] sm:$0xff]  ;;  %v258_v6 = vld [vmem:[%s783_s1 + $0x8] sm:$0xff]  ;;  %s244_s7 = scalar_lea.vmem [#allocation5], %s440_s14  ;;  %s450_s11 = sshll.u32 %s657_s22, 5 }
  0x2b   : > { %v252_v5 = vadd.f32 %v248_v4, %v247_v3  ;;  %286 = vmatpush.msra.mxu0 %v258_v6  ;;  %v257_v7 = vld [vmem:[%s783_s1] sm:$0xff]  ;;  %v263_v10 = vand.u32 127, %v262_v9  ;;  %v325_v23 = vshrl.u32 %v262_v9, 7  ;;  %s356_s13 = scalar_lea.hbm %s787_s5, %s450_s11  ;;  %s357_s15 = sshll.u32 %s244_s7, 4  ;;  %s358_s15 = int_to_ptr.vmem [resolvable:$true] %s357_s15 }
  0x2c   : > { %250 = vadd.xlane.f32.xlu0 %v249_v2  ;;  %v293_v18 = vld [vmem:[%s785_s3] sm:$0xff]  ;;  %s359_s16 = sshll.u32 %s356_s13, 4  ;;  %s345_s17 = scalar_lea.sflag [#allocation4], %s722_s12  ;;  %s360_s16 = int_to_ptr.hbm [resolvable:$true] %s359_s16 }
  0x2d   : > { %287 = vmatpush.msra.mxu0 %v257_v7  ;;  %v265_v12 = vadd.s32 4294967288, %v263_v10  ;;  %314 = vmatpush.msra.mxu1 %v293_v18  ;;  %v259_v19 = vld [vmem:[%s784_s2] sm:$0x1]  ;;  %v332_v24 = vadd.s32 8, %v325_v23  ;;  %s548_s29 = sshra.s32 %s360_s16, 4  ;;  %s554_s8 = scalar_lea.hbm %s787_s5, 64  ;;  %s549_s29 = int_to_ptr.hbm [resolvable:$true] %s548_s29 }
  0x2e   : > { %501 = vset.pattern.permute.xlu1 %v325_v23  ;;  %v294_v25 = vld [vmem:[%s786_s4] sm:$0x1]  ;;  %s550_s14 = scalar_lea.hbm %s549_s29, 32  ;;  %p555_p0 = scmp.lt.s32.totalorder %s549_s29, %s787_s5 }
  0x2f   : > { %503 = vset.pattern.permute.xlu0 %v332_v24  ;;  %p551_p6 = scmp.ne.s32.totalorder %s549_s29, %s550_s14  ;;  %p556_p1 = scmp.lt.s32.totalorder %s554_s8, %s550_s14 }
  0x31   : > { %p552_p9 = pnand %p551_p6, %p686_p11  ;;  %p557_p3 = por %p556_p1, %p555_p0 }
  0x33   : > { %p553_p13 = pneg %p552_p9 }
  0x34   : > { %253 = vadd.xlane.f32.xlu0 %v252_v5 }
  0x35   : > { %p558_p4 = pnand %p557_p3, %p553_p13 }
  0x9f   : > { %v251_v8 = vpop.xlane.xlu0 %250 }
  0xa0   : > { %v255_v11 = vmul.f32 0.00390625, %v251_v8 }
  0xa2   : > { %v264_v15 = vperm.slane %v255_v11, %v263_v10 }
  0xa7   : > { %v254_v13 = vpop.xlane.xlu0 %253 }
  0xa8   : > { %v256_v14 = vmul.f32 0.00390625, %v254_v13 }
  0xaa   : > { %v266_v16 = vperm.slane %v256_v14, %v265_v12 }
  0xac   : > { %v268_v17 = vsel %vm267_vm0, %v266_v16, %v264_v15 }
  0xad   : > { %442 = vmatmul.msk.f32.vlgmr.msra.gmra.mxu0 %vm269_vm1, %v268_v17 }
 0x12a   : > { %v289_v20 = vpop.f32.mrf.mxu0 }
 0x12b   : > { %v290_v21 = vadd.f32 %v289_v20, %v259_v19 }
 0x12d   : > { %v292_v22 = vmax.f32 %v290_v21, 0.0 }
 0x12f   : > { %443 = vmatmul.msk.f32.vlgmr.msra.gmra.mxu1 %vm295_vm2, %v292_v22 }
 0x1ac   : > { %v316_v26 = vpop.f32.mrf.mxu1 }
 0x1ad   : > { %v317_v27 = vadd.f32 %v316_v26, %v294_v25 }
 0x1af   : > { %v319_v28 = vadd.f32 3.0, %v317_v27 }
 0x1b1   : > { %v320_v29 = vmul.f32 0.16666667, %v319_v28 }
 0x1b3   : > { %v321_v30 = vmax.f32 %v320_v29, 0.0 }
 0x1b5   : > { %v322_v31 = vmin.f32 %v321_v30, 1.0 }
 0x1b7   : > { %v323_v32 = vperm.slane %v322_v31, 0 }
 0x1b9   : > { %328 = vperm.xlu1 %501, %v323_v32  }
 0x1c1   : > { %502 = vset.pattern.permute.xlu1 %v332_v24 }
 0x1c9   : > { %334 = vperm.xlu1 %502, %v323_v32  }
 0x22b   : > { %v329_v33 = vpop.permute.xlu1 %328 }
 0x22c   : > { %v336_v34 = vmul.f32 %v329_v33, %v245_v0  ;;  %v337_v35 = vmul.f32 %v329_v33, %v246_v1 }
 0x22e   : > { %340 = vst [vmem:[%s244_s7] sm:$0xff] %v336_v34 }
 0x22f   : > { %341 = vst [vmem:[%s244_s7 + $0x8] sm:$0xff] %v337_v35 }
 0x23b   : > { %v335_v36 = vpop.permute.xlu1 %334 }
 0x23c   : > { %v338_v37 = vmul.f32 %v335_v36, %v247_v3  ;;  %v339_v38 = vmul.f32 %v335_v36, %v248_v4 }
 0x23e   : > { %342 = vst [vmem:[%s244_s7 + $0x10] sm:$0xff] %v338_v37 }
 0x23f   : > { %343 = vst [vmem:[%s244_s7 + $0x18] sm:$0xff] %v339_v38 }
 0x240   : > { %561 = shalt.err (!%p558_p4)
}
 0x241   : > { %s604_s12 = smov 256   ;;  %s605_s10 = smov 16  }
 0x242   : > { %453 = dma.vmem_to_hbm [thread:$0]  (%p686_p11), %s358_s15, 512, %s360_s16, %s345_s17, %s604_s12, %s604_s12, %s605_s10  }
 0x243 PF: > { %s374_s7 = sand.u32 1, %s588_s18   ;;  %p793_p7 = scmp.ge.s32.totalorder %s600_s21, 2 }
 0x244   : > { %s375_s11 = scalar_lea.sflag [#allocation4], %s374_s7 }
 0x245   : > { %p460_p5 = pnand %p793_p7, %p690_p12 }
 0x247   : > { %p461_p8 = pneg %p460_p5 }
 0x249   : > { %583 = dma.done.wait (%p461_p8), %s375_s11, 512  }
 0x24a   : > { %585 = vsyncadd (%p461_p8), %s375_s11, 4294966784  ;;  %p18_p10 = scmp.ge.s32.totalorder %s661_s24, 4   ;;  %s794_s18 = smov %s592_s19 }
 0x24b   : > { %s795_s19 = smov %s596_s20  ;;  %s796_s20 = smov %s673_s27 }
 0x24c   : > { %s797_s21 = smov %s661_s24  ;;  %20 = sbr.rel (!%p18_p10) target bundleno = 5 (0x5), region = 85 }
 0x251   :  { %381 = vsyncpa [#allocation3], 1 }
 0x252   :  { %383 = vsyncpa [#allocation3 + $0x1], 1 }
 0x253   :  { %384 = vsyncpa [#allocation4], 1 }
 0x254   :  { %386 = vsyncpa [#allocation4 + $0x1], 1 }

</bundles_post_ra>
